<compile_context>
chip_gen: v7x
topology: tpu7x:2x2x1
jax: 0.10.0
libtpu: 0.0.40
codegen_flags: <defaults>
</compile_context>

<pallas_src>
import functools

import jax
import jax.numpy as jnp
from jax.experimental import pallas as pl
from jax.experimental.pallas import tpu as pltpu


def _gelu_f32(x):
    # tanh-approximate GELU in f32 (EUP tanh, matches the pure-JAX reference).
    # TODO(synk): bf16 GELU on v6e/v7x would ~2x EUP throughput; kept f32 for
    # numerical fidelity and v5e (no bf16 EUP) compatibility.
    c = jnp.float32(0.7978845608028654)  # sqrt(2/pi)
    return 0.5 * x * (1.0 + jnp.tanh(c * (x + 0.044715 * x * x * x)))


def _dense_gelu_pool_kernel(x_ref, w_ref, b_ref, inv_ref, out_ref, acc_ref):
    """Grid = (M_tiles, N_tiles, K_tiles); K (last axis) is the reduction.

    x_ref:   (tm, tk)  bf16  flattened activations, tm = bm * S
    w_ref:   (tk, tn)  bf16  dense weight tile
    b_ref:   (1, tn)   f32   dense bias tile
    inv_ref: (bm, 1)   f32   1 / attention_mask.sum(seq) per batch element
    out_ref: (bm, tn)  f32   pooled embedding tile
    acc_ref: (tm, tn)  f32   VMEM accumulator (persists across K steps)
    """
    k = pl.program_id(2)

    @pl.when(k == 0)
    def _init():
        acc_ref[...] = jnp.zeros_like(acc_ref)

    # MXU hot path: bf16 x bf16 -> f32 accumulate.
    acc_ref[...] += jnp.dot(x_ref[...], w_ref[...],
                            preferred_element_type=jnp.float32)

    @pl.when(k == pl.num_programs(2) - 1)
    def _finalize():
        tm, tn = acc_ref.shape
        bm = out_ref.shape[0]
        seq = tm // bm

        h = _gelu_f32(acc_ref[...] + b_ref[...])          # (tm, tn) f32

        # Average pooling.  Numerator is the UNMASKED sum over seq (see
        # fidelity note at top).  Sublane-group reduce: stays in f32, runs on
        # the XLU, no MXU work and no iota/pool-matrix rebuild per tile.
        pooled = h.reshape(bm, seq, tn).sum(axis=1)       # (bm, tn) f32

        out_ref[...] = pooled * inv_ref[...]              # / mask count


@functools.partial(jax.jit, static_argnames=("tn", "tk", "bm"))
def text_embedding_forward(x_emb, attention_mask, w, b, *, tn=None, tk=None,
                           bm=None):
    """x_emb: [B, S, H] (bf16 preferred), attention_mask: [B, S] 0/1,
    w: [H, H], b: [H].  Returns pooled embeddings [B, H] f32."""
    B, S, H = x_emb.shape
    assert S % 8 == 0, "sequence length must be a multiple of 8"
    M = B * S

    def _pick(size, prefs):
        for t in prefs:
            if t <= size and size % t == 0:
                return t
        return size

    # MXU-sized K tile; lane-dense N tile.  tn = H when it fits -> x is read
    # from HBM exactly once (no per-N-tile refetch of the activation stream).
    if tk is None:
        tk = _pick(H, (512, 256, 128))
    if tn is None:
        tn = H if H <= 1024 else _pick(H, (512, 256, 128))
    assert H % tn == 0 and H % tk == 0, "H must be a multiple of the N/K tiles"

    # Batch tile: target ~512 activation rows, multiple of 8 when possible
    # (unmasked output stores); never default to the whole batch blindly.
    if bm is None:
        target = max(8, -(-512 // S))
        cands = [d for d in range(8, B + 1, 8) if B % d == 0 and d <= target]
        bm = max(cands) if cands else B
    assert B % bm == 0 and (bm == B or bm % 8 == 0)
    tm = bm * S

    # bf16 MXU operands (no-op casts if the producer already emits bf16).
    x2 = x_emb.reshape(M, H).astype(jnp.bfloat16)
    w_bf = w.astype(jnp.bfloat16)
    b2 = b.reshape(1, H).astype(jnp.float32)

    # NOTE: like the PyTorch reference, fully-masked rows divide by zero.
    denom = attention_mask.astype(jnp.float32).sum(axis=1)        # (B,)
    inv_denom = (1.0 / denom).reshape(B, 1)                       # (B, 1)

    grid = (B // bm, H // tn, H // tk)
    n_i, n_j, n_k = grid

    # VMEM budget (double-buffered inputs/outputs + resident accumulator),
    # kept under a v7x-safe 40 MiB ceiling (64 MiB physical on v7x).
    vmem_bytes = (2 * tm * tk * 2          # x double buffer (bf16)
                  + 2 * tk * tn * 2        # w double buffer (bf16)
                  + 2 * tn * 4             # bias
                  + 2 * bm * 4             # 1/denom
                  + 2 * bm * tn * 4        # output double buffer
                  + tm * tn * 4)           # accumulator
    assert vmem_bytes <= (40 << 20), (
        "tile sizes exceed the v7x-safe VMEM budget; pass smaller bm/tn/tk")
    vmem_limit = min(max(2 * vmem_bytes, 16 << 20), 40 << 20)

    cost = pl.CostEstimate(
        flops=2 * M * H * H,
        transcendentals=M * H,
        bytes_accessed=int(M * H * 2 * n_j        # x re-streamed per N tile
                           + H * H * 2 * n_i      # w re-streamed per M tile
                           + H * 4 * n_i * n_j    # bias
                           + B * 4 * n_j          # 1/denom
                           + B * H * 4),          # output
    )

    # NOTE(v7x): for best megacore utilization keep B//bm >= 2 or H//tn >= 2.
    out = pl.pallas_call(
        _dense_gelu_pool_kernel,
        out_shape=jax.ShapeDtypeStruct((B, H), jnp.float32),
        grid_spec=pltpu.PrefetchScalarGridSpec(
            num_scalar_prefetch=0,
            grid=grid,
            in_specs=[
                pl.BlockSpec((tm, tk), lambda i, j, k: (i, k)),   # x  (bf16)
                pl.BlockSpec((tk, tn), lambda i, j, k: (k, j)),   # w  (bf16)
                pl.BlockSpec((1, tn), lambda i, j, k: (0, j)),    # bias
                pl.BlockSpec((bm, 1), lambda i, j, k: (i, 0)),    # 1/denom
            ],
            out_specs=pl.BlockSpec((bm, tn), lambda i, j, k: (i, j)),
            scratch_shapes=[pltpu.VMEM((tm, tn), jnp.float32)],
        ),
        compiler_params=pltpu.CompilerParams(
            dimension_semantics=("parallel", "parallel", "arbitrary"),
            vmem_limit_bytes=int(vmem_limit),
        ),
        cost_estimate=cost,
    )(x2, w_bf, b2, inv_denom)
    return out


if __name__ == "__main__":
    # Small but lane-dense shapes (H multiple of 128, S multiple of 8).
    B, S, H, VOCAB = 4, 8, 256, 100

    key = jax.random.PRNGKey(0)
    k_ids, k_emb, k_w, k_b = jax.random.split(key, 4)

    # Deterministic synthetic "encoded_batch".
    input_ids = jax.random.randint(k_ids, (B, S), 0, VOCAB)
    lengths = jnp.array([S, S // 2, S, 3], dtype=jnp.int32)      # all >= 1
    attention_mask = (jnp.arange(S)[None, :] < lengths[:, None]).astype(jnp.int32)

    # Deterministic synthetic parameters (stand-in encoder).  The embedding
    # table is kept in bf16 so the gather already produces the kernel's MXU
    # dtype (no extra HBM cast pass over the activations).
    embedding_table = (jax.random.normal(k_emb, (VOCAB, H), dtype=jnp.float32)
                       * 0.02).astype(jnp.bfloat16)
    w = jax.random.normal(k_w, (H, H), dtype=jnp.float32) * 0.05
    b = jax.random.normal(k_b, (H,), dtype=jnp.float32) * 0.01

    # Glue: embedding lookup in plain JAX (output is bf16).
    x_emb = jnp.take(embedding_table, input_ids, axis=0)          # [B, S, H]

    emb = text_embedding_forward(x_emb, attention_mask, w, b)
    emb = jax.block_until_ready(emb)

    # Pure-JAX reference with the same bf16-rounded MXU operands and the same
    # faithful-to-PyTorch pooling semantics (unmasked numerator).
    xr = x_emb.astype(jnp.float32)
    wr = w.astype(jnp.bfloat16).astype(jnp.float32)
    h_ref = jnp.einsum("bsh,hk->bsk", xr, wr,
                       precision=jax.lax.Precision.HIGHEST) + b
    h_ref = _gelu_f32(h_ref)
    denom_ref = attention_mask.sum(axis=1).astype(jnp.float32)
    ref = h_ref.sum(axis=1) / denom_ref[:, None]

    assert emb.shape == (B, H)
    assert bool(jnp.allclose(emb, ref, atol=1e-4, rtol=1e-4)), \
        "mismatch vs reference"

    print("KERNEL_OK")
</pallas_src>

<mosaic_0001>
module attributes {stable_mosaic.version = 11 : i64} {
  func.func @_dense_gelu_pool_kernel(%arg0: i32, %arg1: i32, %arg2: i32, %arg3: memref<32x256xbf16, #tpu.memory_space<vmem>>, %arg4: memref<256x256xbf16, #tpu.memory_space<vmem>>, %arg5: memref<1x256xf32, #tpu.memory_space<vmem>>, %arg6: memref<4x1xf32, #tpu.memory_space<vmem>>, %arg7: memref<4x256xf32, #tpu.memory_space<vmem>>, %arg8: memref<32x256xf32, #tpu.memory_space<vmem>>) attributes {dimension_semantics = [#tpu.dimension_semantics<parallel>, #tpu.dimension_semantics<parallel>, #tpu.dimension_semantics<arbitrary>], iteration_bounds = array<i64: 1, 1, 1>, scalar_prefetch = 0 : i64, scratch_operands = 1 : i64, tpu.core_type = #tpu.core_type<tc>, window_params = [{transform_indices = @transform_0, window_bounds = array<i64: 32, 256>}, {transform_indices = @transform_1, window_bounds = array<i64: 256, 256>}, {transform_indices = @transform_2, window_bounds = array<i64: 1, 256>}, {transform_indices = @transform_3, window_bounds = array<i64: 4, 1>}, {transform_indices = @transform_4, window_bounds = array<i64: 4, 256>}]} {
    %c0_i32 = arith.constant 0 : i32
    %0 = arith.cmpi eq, %arg2, %c0_i32 : i32
    %1 = arith.extui %0 : i1 to i32
    %c0_i32_0 = arith.constant 0 : i32
    %2 = arith.cmpi ne, %1, %c0_i32_0 : i32
    scf.if %2 {
      %cst_10 = arith.constant 0.000000e+00 : f32
      %12 = vector.broadcast %cst_10 : f32 to vector<32x256xf32>
      %c0_11 = arith.constant 0 : index
      %c0_12 = arith.constant 0 : index
      %13 = vector.load %arg8[%c0_11, %c0_12] : memref<32x256xf32, #tpu.memory_space<vmem>>, vector<32x256xf32>
      tpu.vector_store %arg8[%c0_11, %c0_12], %12 {strides = array<i32>} : memref<32x256xf32, #tpu.memory_space<vmem>>, vector<32x256xf32>,
    } else {
    }
    %c0 = arith.constant 0 : index
    %c0_1 = arith.constant 0 : index
    %3 = vector.load %arg8[%c0, %c0_1] : memref<32x256xf32, #tpu.memory_space<vmem>>, vector<32x256xf32>
    %c0_2 = arith.constant 0 : index
    %c0_3 = arith.constant 0 : index
    %4 = vector.load %arg3[%c0_2, %c0_3] : memref<32x256xbf16, #tpu.memory_space<vmem>>, vector<32x256xbf16>
    %c0_4 = arith.constant 0 : index
    %c0_5 = arith.constant 0 : index
    %5 = vector.load %arg4[%c0_4, %c0_5] : memref<256x256xbf16, #tpu.memory_space<vmem>>, vector<256x256xbf16>
    %cst = arith.constant dense<0.000000e+00> : vector<32x256xf32>
    %6 = tpu.matmul %4, %5, %cst {dimension_numbers = #tpu.dot_dimension_numbers<[1], [0], [0], [1], [0, 0, 1, 1], [], []>} : vector<32x256xbf16>, vector<256x256xbf16>, vector<32x256xf32> -> vector<32x256xf32>
    %7 = arith.addf %3, %6 : vector<32x256xf32>
    %c0_6 = arith.constant 0 : index
    %c0_7 = arith.constant 0 : index
    %8 = vector.load %arg8[%c0_6, %c0_7] : memref<32x256xf32, #tpu.memory_space<vmem>>, vector<32x256xf32>
    tpu.vector_store %arg8[%c0_6, %c0_7], %7 {strides = array<i32>} : memref<32x256xf32, #tpu.memory_space<vmem>>, vector<32x256xf32>,
    %c0_i32_8 = arith.constant 0 : i32
    %9 = arith.cmpi eq, %arg2, %c0_i32_8 : i32
    %10 = arith.extui %9 : i1 to i32
    %c0_i32_9 = arith.constant 0 : i32
    %11 = arith.cmpi ne, %10, %c0_i32_9 : i32
    scf.if %11 {
      %c0_10 = arith.constant 0 : index
      %c0_11 = arith.constant 0 : index
      %12 = vector.load %arg8[%c0_10, %c0_11] : memref<32x256xf32, #tpu.memory_space<vmem>>, vector<32x256xf32>
      %c0_12 = arith.constant 0 : index
      %c0_13 = arith.constant 0 : index
      %13 = vector.load %arg5[%c0_12, %c0_13] : memref<1x256xf32, #tpu.memory_space<vmem>>, vector<1x256xf32>
      %14 = vector.broadcast %13 : vector<1x256xf32> to vector<32x256xf32>
      %15 = arith.addf %12, %14 : vector<32x256xf32>
      %cst_14 = arith.constant 5.000000e-01 : f32
      %16 = vector.broadcast %cst_14 : f32 to vector<32x256xf32>
      %17 = arith.mulf %16, %15 : vector<32x256xf32>
      %cst_15 = arith.constant 4.471500e-02 : f32
      %18 = vector.broadcast %cst_15 : f32 to vector<32x256xf32>
      %19 = arith.mulf %18, %15 : vector<32x256xf32>
      %20 = arith.mulf %19, %15 : vector<32x256xf32>
      %21 = arith.mulf %20, %15 : vector<32x256xf32>
      %22 = arith.addf %15, %21 : vector<32x256xf32>
      %cst_16 = arith.constant 0.797884583 : f32
      %23 = vector.broadcast %cst_16 : f32 to vector<32x256xf32>
      %24 = arith.mulf %23, %22 : vector<32x256xf32>
      %25 = math.tanh %24 : vector<32x256xf32>
      %cst_17 = arith.constant 1.000000e+00 : f32
      %26 = vector.broadcast %cst_17 : f32 to vector<32x256xf32>
      %27 = arith.addf %26, %25 : vector<32x256xf32>
      %28 = arith.mulf %17, %27 : vector<32x256xf32>
      %29 = vector.shape_cast %28 : vector<32x256xf32> to vector<4x8x256xf32>
      %cst_18 = arith.constant dense<0.000000e+00> : vector<4x256xf32>
      %30 = vector.multi_reduction <add>, %29, %cst_18 [1] : vector<4x8x256xf32> to vector<4x256xf32>
      %c0_19 = arith.constant 0 : index
      %c0_20 = arith.constant 0 : index
      %31 = vector.load %arg6[%c0_19, %c0_20] : memref<4x1xf32, #tpu.memory_space<vmem>>, vector<4x1xf32>
      %32 = vector.broadcast %31 : vector<4x1xf32> to vector<4x256xf32>
      %33 = arith.mulf %30, %32 : vector<4x256xf32>
      %c0_21 = arith.constant 0 : index
      %c0_22 = arith.constant 0 : index
      %34 = vector.load %arg7[%c0_21, %c0_22] : memref<4x256xf32, #tpu.memory_space<vmem>>, vector<4x256xf32>
      tpu.vector_store %arg7[%c0_21, %c0_22], %33 {strides = array<i32>} : memref<4x256xf32, #tpu.memory_space<vmem>>, vector<4x256xf32>,
    } else {
    }
    return
  }
  func.func @transform_0(%arg0: i32, %arg1: i32, %arg2: i32) -> (i32, i32) {
    %c0_i32 = arith.constant 0 : i32
    return %arg0, %arg2 : i32, i32
  }
  func.func @transform_1(%arg0: i32, %arg1: i32, %arg2: i32) -> (i32, i32) {
    %c0_i32 = arith.constant 0 : i32
    return %arg2, %arg1 : i32, i32
  }
  func.func @transform_2(%arg0: i32, %arg1: i32, %arg2: i32) -> (i32, i32) {
    %c0_i32 = arith.constant 0 : i32
    %c0_i32_0 = arith.constant 0 : i32
    return %c0_i32, %arg1 : i32, i32
  }
  func.func @transform_3(%arg0: i32, %arg1: i32, %arg2: i32) -> (i32, i32) {
    %c0_i32 = arith.constant 0 : i32
    %c0_i32_0 = arith.constant 0 : i32
    return %arg0, %c0_i32 : i32, i32
  }
  func.func @transform_4(%arg0: i32, %arg1: i32, %arg2: i32) -> (i32, i32) {
    %c0_i32 = arith.constant 0 : i32
    return %arg0, %arg1 : i32, i32
  }
}

</mosaic_0001>

<bundles_post_ra>
// kernel: text_embedding_forward.1
= control target key start
LH: loop header
LB: loop body
LE: loop exit
PB: predicated region body
PF: predicated region fallthrough
CT: control target
= control target key end

     0   :  { %v702_v2 = vmov 0   ;;  %s926_s0 = inlined_call_operand.vmem [shape: bf16[32,256], index: 0, kind: input, shape index: {}]   ;;  %s927_s1 = inlined_call_operand.vmem [shape: bf16[256,256], index: 1, kind: input, shape index: {}]   ;;  %s928_s2 = inlined_call_operand.vmem [shape: f32[1,256], index: 2, kind: input, shape index: {}]   ;;  %s929_s3 = inlined_call_operand.vmem [shape: f32[4,1], index: 3, kind: input, shape index: {}]   ;;  %s930_s4 = inlined_call_operand.hbm [shape: f32[4,256], index: 4, kind: output, shape index: {}]  }
   0x1   :  { %v608_v0 = vld [vmem:[%s927_s1 + $0x4] ss:$8 sps:$4 sm:$0xff]   ;;  %v610_v1 = vld [vmem:[%s927_s1] ss:$8 sps:$4 sm:$0xff]   ;;  %607 = vset.pattern.permute.xlu0 %v702_v2  ;;  %v611_v3 = vld [vmem:[%s927_s1 + $0x14] ss:$8 sps:$4 sm:$0xff]  }
   0x2   :  { %254 = vmatprep.subr.bf16.mxu0 %v608_v0  ;;  %573 = vmatprep.subr.bf16.mxu1 %v608_v0  ;;  %v613_v4 = vld [vmem:[%s927_s1 + $0x10] ss:$8 sps:$4 sm:$0xff]   ;;  %v614_v5 = vld [vmem:[%s927_s1 + $0x24] ss:$8 sps:$4 sm:$0xff]   ;;  %v616_v6 = vld [vmem:[%s927_s1 + $0x20] ss:$8 sps:$4 sm:$0xff]  }
   0x3   :  { %255 = vmatpush1.bf16.msra.mxu0 %v610_v1  ;;  %589 = vmatpush1.bf16.msra.mxu1 %v610_v1  ;;  %v617_v7 = vld [vmem:[%s927_s1 + $0x34] ss:$8 sps:$4 sm:$0xff]   ;;  %v619_v8 = vld [vmem:[%s927_s1 + $0x30] ss:$8 sps:$4 sm:$0xff]   ;;  %v620_v9 = vld [vmem:[%s927_s1 + $0x44] ss:$8 sps:$4 sm:$0xff]  }
   0x4   :  { %256 = vmatprep.subr.bf16.mxu0 %v611_v3  ;;  %574 = vmatprep.subr.bf16.mxu1 %v611_v3  ;;  %v622_v10 = vld [vmem:[%s927_s1 + $0x40] ss:$8 sps:$4 sm:$0xff]   ;;  %v623_v11 = vld [vmem:[%s927_s1 + $0x54] ss:$8 sps:$4 sm:$0xff]   ;;  %v625_v12 = vld [vmem:[%s927_s1 + $0x50] ss:$8 sps:$4 sm:$0xff]  }
   0x5   :  { %v626_v13 = vld [vmem:[%s927_s1 + $0x64] ss:$8 sps:$4 sm:$0xff]   ;;  %v628_v15 = vld [vmem:[%s927_s1 + $0x60] ss:$8 sps:$4 sm:$0xff]   ;;  %v661_v16 = vld [vmem:[%s926_s0 + $0x14] ss:$8 sps:$4 sm:$0xff]  }
   0x6   :  { %v658_v14 = vld [vmem:[%s926_s0 + $0x4] ss:$8 sps:$4 sm:$0xff]   ;;  %v629_v17 = vld [vmem:[%s927_s1 + $0x74] ss:$8 sps:$4 sm:$0xff]   ;;  %v474_v18 = vld [vmem:[%s929_s3] sm:$0xf] }
   0x7   :  { %257 = vmatpush1.bf16.msra.mxu0 %v613_v4  ;;  %590 = vmatpush1.bf16.msra.mxu1 %v613_v4 }
   0x8   :  { %258 = vmatprep.subr.bf16.mxu0 %v614_v5  ;;  %575 = vmatprep.subr.bf16.mxu1 %v614_v5 }
   0xb   :  { %259 = vmatpush1.bf16.msra.mxu0 %v616_v6  ;;  %591 = vmatpush1.bf16.msra.mxu1 %v616_v6 }
   0xc   :  { %260 = vmatprep.subr.bf16.mxu0 %v617_v7  ;;  %576 = vmatprep.subr.bf16.mxu1 %v617_v7 }
   0xf   :  { %261 = vmatpush1.bf16.msra.mxu0 %v619_v8  ;;  %592 = vmatpush1.bf16.msra.mxu1 %v619_v8 }
  0x10   :  { %262 = vmatprep.subr.bf16.mxu0 %v620_v9  ;;  %577 = vmatprep.subr.bf16.mxu1 %v620_v9 }
  0x13   :  { %263 = vmatpush1.bf16.msra.mxu0 %v622_v10  ;;  %593 = vmatpush1.bf16.msra.mxu1 %v622_v10 }
  0x14   :  { %264 = vmatprep.subr.bf16.mxu0 %v623_v11  ;;  %578 = vmatprep.subr.bf16.mxu1 %v623_v11 }
  0x17   :  { %265 = vmatpush1.bf16.msra.mxu0 %v625_v12  ;;  %594 = vmatpush1.bf16.msra.mxu1 %v625_v12 }
  0x18   :  { %266 = vmatprep.subr.bf16.mxu0 %v626_v13  ;;  %579 = vmatprep.subr.bf16.mxu1 %v626_v13 }
  0x19   :  { %9 = vsyncpa [#allocation4], 0  ;;  %286 = vmatprep.mubr.bf16.mxu0 %v658_v14  ;;  %296 = vmatprep.mubr.bf16.mxu1 %v661_v16  ;;  %v631_v19 = vld [vmem:[%s927_s1 + $0x70] ss:$8 sps:$4 sm:$0xff]   ;;  %v632_v20 = vld [vmem:[%s927_s1 + $0x84] ss:$8 sps:$4 sm:$0xff]   ;;  %v336_v38 = vlaneseq }
  0x1a   :  { %477 = vperm.xlu0 %607, %v474_v18   ;;  %v634_v21 = vld [vmem:[%s927_s1 + $0x80] ss:$8 sps:$4 sm:$0xff]   ;;  %v635_v22 = vld [vmem:[%s927_s1 + $0x94] ss:$8 sps:$4 sm:$0xff]   ;;  %v637_v23 = vld [vmem:[%s927_s1 + $0x90] ss:$8 sps:$4 sm:$0xff]  }
  0x1b   :  { %267 = vmatpush1.bf16.msra.mxu0 %v628_v15  ;;  %595 = vmatpush1.bf16.msra.mxu1 %v628_v15  ;;  %v638_v24 = vld [vmem:[%s927_s1 + $0xa4] ss:$8 sps:$4 sm:$0xff]   ;;  %v640_v25 = vld [vmem:[%s927_s1 + $0xa0] ss:$8 sps:$4 sm:$0xff]   ;;  %v641_v26 = vld [vmem:[%s927_s1 + $0xb4] ss:$8 sps:$4 sm:$0xff]  }
  0x1c   :  { %268 = vmatprep.subr.bf16.mxu0 %v629_v17  ;;  %580 = vmatprep.subr.bf16.mxu1 %v629_v17  ;;  %v643_v27 = vld [vmem:[%s927_s1 + $0xb0] ss:$8 sps:$4 sm:$0xff]   ;;  %v644_v28 = vld [vmem:[%s927_s1 + $0xc4] ss:$8 sps:$4 sm:$0xff]   ;;  %v646_v29 = vld [vmem:[%s927_s1 + $0xc0] ss:$8 sps:$4 sm:$0xff]  }
  0x1d   :  { %v647_v30 = vld [vmem:[%s927_s1 + $0xd4] ss:$8 sps:$4 sm:$0xff]   ;;  %v649_v31 = vld [vmem:[%s927_s1 + $0xd0] ss:$8 sps:$4 sm:$0xff]   ;;  %v650_v32 = vld [vmem:[%s927_s1 + $0xe4] ss:$8 sps:$4 sm:$0xff]  }
  0x1e   :  { %v652_v33 = vld [vmem:[%s927_s1 + $0xe0] ss:$8 sps:$4 sm:$0xff]   ;;  %v653_v34 = vld [vmem:[%s927_s1 + $0xf4] ss:$8 sps:$4 sm:$0xff]   ;;  %v655_v35 = vld [vmem:[%s927_s1 + $0xf0] ss:$8 sps:$4 sm:$0xff]  }
  0x1f   :  { %269 = vmatpush1.bf16.msra.mxu0 %v631_v19  ;;  %596 = vmatpush1.bf16.msra.mxu1 %v631_v19  ;;  %v656_v36 = vld [vmem:[%s926_s0] ss:$8 sps:$4 sm:$0xff]   ;;  %v659_v37 = vld [vmem:[%s926_s0 + $0x10] ss:$8 sps:$4 sm:$0xff]   ;;  %v337_v39 = vshrl.u32 %v336_v38, 7  ;;  %vm507_vm0 = vcmask 1041409  }
  0x20   :  { %270 = vmatprep.subr.bf16.mxu0 %v632_v20  ;;  %581 = vmatprep.subr.bf16.mxu1 %v632_v20  ;;  %v334_v41 = vld [vmem:[%s928_s2] sm:$0x3]  ;;  %vm509_vm1 = vcmask 1045509   ;;  %vm512_vm2 = vcmask 1042434   ;;  %vm514_vm3 = vcmask 1046534   ;;  %vm517_vm4 = vcmask 1043459  }
  0x21   :  { %v338_v40 = vsub.s32 0, %v337_v39  ;;  %v342_v42 = vsub.s32 1, %v337_v39  ;;  %s703_s0 = smov [#allocation3]   ;;  %vm519_vm5 = vcmask 1047559  }
  0x22   :  { %s529_s1 = sshll.u32 %s703_s0, 4  ;;  %s530_s1 = int_to_ptr.vmem [resolvable:$true] %s529_s1 }
  0x23   :  { %271 = vmatpush1.bf16.msra.mxu0 %v634_v21  ;;  %597 = vmatpush1.bf16.msra.mxu1 %v634_v21  ;;  %v339_v43 = vrot.slane %v334_v41, %v338_v40  ;;  %v343_v44 = vrot.slane %v334_v41, %v342_v42  ;;  %s678_s2 = scalar_lea.vmem %s530_s1, 128  ;;  %p683_p1 = scmp.lt.s32.totalorder %s530_s1, %s530_s1 }
  0x24   :  { %272 = vmatprep.subr.bf16.mxu0 %v635_v22  ;;  %582 = vmatprep.subr.bf16.mxu1 %v635_v22  ;;  %p679_p0 = scmp.ne.s32.totalorder %s530_s1, %s678_s2  ;;  %p684_p2 = scmp.lt.s32.totalorder %s678_s2, %s678_s2 }
  0x26   :  { %p685_p3 = por %p684_p2, %p683_p1 }
  0x27   :  { %273 = vmatpush1.bf16.msra.mxu0 %v637_v23  ;;  %598 = vmatpush1.bf16.msra.mxu1 %v637_v23 }
  0x28   :  { %274 = vmatprep.subr.bf16.mxu0 %v638_v24  ;;  %583 = vmatprep.subr.bf16.mxu1 %v638_v24  ;;  %p686_p4 = pnand %p685_p3, %p679_p0 }
  0x2b   :  { %275 = vmatpush1.bf16.msra.mxu0 %v640_v25  ;;  %599 = vmatpush1.bf16.msra.mxu1 %v640_v25 }
  0x2c   :  { %276 = vmatprep.subr.bf16.mxu0 %v641_v26  ;;  %584 = vmatprep.subr.bf16.mxu1 %v641_v26 }
  0x2f   :  { %277 = vmatpush1.bf16.msra.mxu0 %v643_v27  ;;  %600 = vmatpush1.bf16.msra.mxu1 %v643_v27 }
  0x30   :  { %278 = vmatprep.subr.bf16.mxu0 %v644_v28  ;;  %585 = vmatprep.subr.bf16.mxu1 %v644_v28 }
  0x33   :  { %279 = vmatpush1.bf16.msra.mxu0 %v646_v29  ;;  %601 = vmatpush1.bf16.msra.mxu1 %v646_v29 }
  0x34   :  { %280 = vmatprep.subr.bf16.mxu0 %v647_v30  ;;  %586 = vmatprep.subr.bf16.mxu1 %v647_v30 }
  0x37   :  { %281 = vmatpush1.bf16.msra.mxu0 %v649_v31  ;;  %602 = vmatpush1.bf16.msra.mxu1 %v649_v31 }
  0x38   :  { %282 = vmatprep.subr.bf16.mxu0 %v650_v32  ;;  %587 = vmatprep.subr.bf16.mxu1 %v650_v32 }
  0x3b   :  { %283 = vmatpush1.bf16.msra.mxu0 %v652_v33  ;;  %603 = vmatpush1.bf16.msra.mxu1 %v652_v33 }
  0x3c   :  { %284 = vmatprep.subr.bf16.mxu0 %v653_v34  ;;  %588 = vmatprep.subr.bf16.mxu1 %v653_v34 }
  0x3f   :  { %285 = vmatpush1.bf16.msra.mxu0 %v655_v35  ;;  %604 = vmatpush1.bf16.msra.mxu1 %v655_v35 }
  0x42   :  { %287 = vmatmul.mubr.bf16.vlgmr.msra.gmra.mrb[0].mxu0 %v656_v36  ;;  %297 = vmatmul.mubr.bf16.vlgmr.msra.gmra.mrb[0].mxu1 %v659_v37 }
  0x99   :  { %v891_v38 = vpop.permute.xlu0 %477 }
 0x115   :  { %v288_v45 = vpop.f32.mrb[0].mxu0  ;;  %v298_v46 = vpop.f32.mrb[0].mxu1 }
 0x116   :  { %v843_v47 = vadd.f32 %v339_v43, %v288_v45  ;;  %v845_v48 = vadd.f32 %v339_v43, %v298_v46  ;;  %v290_v49 = vpop.f32.mrb[1].mxu0  ;;  %v300_v50 = vpop.f32.mrb[1].mxu1 }
 0x117   :  { %v847_v51 = vadd.f32 %v343_v44, %v290_v49  ;;  %v849_v52 = vadd.f32 %v343_v44, %v300_v50  ;;  %v292_v53 = vpop.f32.mrb[2].mxu0  ;;  %v302_v54 = vpop.f32.mrb[2].mxu1 }
 0x118   :  { %v362_v55 = vmul.f32 0.044715, %v843_v47  ;;  %v366_v56 = vmul.f32 0.044715, %v845_v48  ;;  %v857_v61 = vadd.f32 %v339_v43, %v292_v53  ;;  %v859_v62 = vadd.f32 %v339_v43, %v302_v54  ;;  %v294_v63 = vpop.f32.mrb[3].mxu0  ;;  %v304_v0 = vpop.f32.mrb[3].mxu1 }
 0x119   :  { %v363_v57 = vmul.f32 0.044715, %v847_v51  ;;  %v367_v58 = vmul.f32 0.044715, %v849_v52  ;;  %v863_v3 = vadd.f32 %v343_v44, %v294_v63  ;;  %v874_v13 = vadd.f32 %v343_v44, %v304_v0 }
 0x11a   :  { %v370_v59 = vmul.f32 %v362_v55, %v843_v47  ;;  %v374_v60 = vmul.f32 %v366_v56, %v845_v48  ;;  %v364_v6 = vmul.f32 0.044715, %v857_v61  ;;  %v368_v9 = vmul.f32 0.044715, %v859_v62 }
 0x11b   :  { %v371_v1 = vmul.f32 %v363_v57, %v847_v51  ;;  %v375_v2 = vmul.f32 %v367_v58, %v849_v52  ;;  %v365_v17 = vmul.f32 0.044715, %v863_v3  ;;  %v369_v26 = vmul.f32 0.044715, %v874_v13 }
 0x11c   :  { %v378_v4 = vmul.f32 %v370_v59, %v843_v47  ;;  %v382_v5 = vmul.f32 %v374_v60, %v845_v48  ;;  %v372_v12 = vmul.f32 %v364_v6, %v857_v61  ;;  %v376_v16 = vmul.f32 %v368_v9, %v859_v62 }
 0x11d   :  { %v379_v7 = vmul.f32 %v371_v1, %v847_v51  ;;  %v383_v8 = vmul.f32 %v375_v2, %v849_v52  ;;  %v373_v24 = vmul.f32 %v365_v17, %v863_v3  ;;  %v377_v30 = vmul.f32 %v369_v26, %v874_v13 }
 0x11e   :  { %v386_v10 = vadd.f32 %v378_v4, %v843_v47  ;;  %v390_v11 = vadd.f32 %v382_v5, %v845_v48  ;;  %v380_v20 = vmul.f32 %v372_v12, %v857_v61  ;;  %v384_v23 = vmul.f32 %v376_v16, %v859_v62 }
 0x11f   :  { %v387_v14 = vadd.f32 %v379_v7, %v847_v51  ;;  %v391_v15 = vadd.f32 %v383_v8, %v849_v52  ;;  %v381_v28 = vmul.f32 %v373_v24, %v863_v3  ;;  %v385_v33 = vmul.f32 %v377_v30, %v874_v13 }
 0x120   :  { %v394_v18 = vmul.f32 0.7978846, %v386_v10  ;;  %v398_v19 = vmul.f32 0.7978846, %v390_v11  ;;  %v388_v25 = vadd.f32 %v380_v20, %v857_v61  ;;  %v392_v27 = vadd.f32 %v384_v23, %v859_v62 }
 0x121   :  { %v395_v21 = vmul.f32 0.7978846, %v387_v14  ;;  %v399_v22 = vmul.f32 0.7978846, %v391_v15  ;;  %v389_v32 = vadd.f32 %v381_v28, %v863_v3  ;;  %v393_v35 = vadd.f32 %v385_v33, %v874_v13 }
 0x122   :  { %662 = vtanh.f32 %v394_v18  ;;  %v396_v29 = vmul.f32 0.7978846, %v388_v25  ;;  %v400_v31 = vmul.f32 0.7978846, %v392_v27  ;;  %v354_v40 = vmul.f32 0.5, %v843_v47 }
 0x123   :  { %664 = vtanh.f32 %v398_v19  ;;  %v397_v34 = vmul.f32 0.7978846, %v389_v32  ;;  %v401_v36 = vmul.f32 0.7978846, %v393_v35  ;;  %v358_v43 = vmul.f32 0.5, %v845_v48 }
 0x124   :  { %666 = vtanh.f32 %v395_v21  ;;  %v355_v46 = vmul.f32 0.5, %v847_v51  ;;  %v480_v53 = vrot.slane %v891_v38, 2  ;;  %v359_v56 = vmul.f32 0.5, %v849_v52 }
 0x125   :  { %668 = vtanh.f32 %v399_v22  ;;  %v479_v58 = vrot.slane %v891_v38, 1  ;;  %v356_v59 = vmul.f32 0.5, %v857_v61  ;;  %v360_v51 = vmul.f32 0.5, %v859_v62 }
 0x126   :  { %670 = vtanh.f32 %v396_v29  ;;  %v357_v6 = vmul.f32 0.5, %v863_v3  ;;  %v361_v61 = vmul.f32 0.5, %v874_v13 }
 0x127   :  { %672 = vtanh.f32 %v400_v31 }
 0x128   :  { %674 = vtanh.f32 %v397_v34 }
 0x129   :  { %676 = vtanh.f32 %v401_v36 }
 0x12c   :  { %v663_v37 = vpop.eup %662 }
 0x12d   :  { %v665_v39 = vpop.eup %664  ;;  %v410_v41 = vadd.f32 1.0, %v663_v37 }
 0x12e   :  { %v667_v42 = vpop.eup %666  ;;  %v414_v44 = vadd.f32 1.0, %v665_v39 }
 0x12f   :  { %v669_v45 = vpop.eup %668  ;;  %v411_v49 = vadd.f32 1.0, %v667_v42  ;;  %v418_v50 = vmul.f32 %v410_v41, %v354_v40 }
 0x130   :  { %v671_v54 = vpop.eup %670  ;;  %v422_v55 = vmul.f32 %v414_v44, %v358_v43  ;;  %v415_v57 = vadd.f32 1.0, %v669_v45 }
 0x131   :  { %v673_v47 = vpop.eup %672  ;;  %v412_v60 = vadd.f32 1.0, %v671_v54  ;;  %v419_v48 = vmul.f32 %v411_v49, %v355_v46  ;;  %v426_v63 = vrot.slane %v418_v50, 4 }
 0x132   :  { %v423_v0 = vmul.f32 %v415_v57, %v359_v56  ;;  %v416_v1 = vadd.f32 1.0, %v673_v47  ;;  %v450_v2 = vrot.slane %v422_v55, 4  ;;  %v675_v4 = vpop.eup %674 }
 0x133   :  { %v420_v5 = vmul.f32 %v412_v60, %v356_v59  ;;  %v427_v7 = vadd.f32 %v426_v63, %v418_v50  ;;  %v432_v52 = vrot.slane %v419_v48, 4  ;;  %v413_v9 = vadd.f32 1.0, %v675_v4  ;;  %v677_v16 = vpop.eup %676 }
 0x134   :  { %v424_v8 = vmul.f32 %v416_v1, %v360_v51  ;;  %v451_v10 = vadd.f32 %v450_v2, %v422_v55  ;;  %v456_v11 = vrot.slane %v423_v0, 4  ;;  %v417_v20 = vadd.f32 1.0, %v677_v16 }
 0x135   :  { %v428_v12 = vrot.slane %v427_v7, 2  ;;  %v433_v14 = vadd.f32 %v432_v52, %v419_v48  ;;  %v438_v15 = vrot.slane %v420_v5, 4  ;;  %v421_v17 = vmul.f32 %v413_v9, %v357_v6 }
 0x136   :  { %v452_v62 = vrot.slane %v451_v10, 2  ;;  %v457_v18 = vadd.f32 %v456_v11, %v423_v0  ;;  %v462_v19 = vrot.slane %v424_v8, 4  ;;  %v425_v27 = vmul.f32 %v417_v20, %v361_v61 }
 0x137   :  { %v429_v21 = vadd.f32 %v428_v12, %v427_v7  ;;  %v434_v22 = vrot.slane %v433_v14, 2  ;;  %v439_v3 = vadd.f32 %v438_v15, %v420_v5  ;;  %v444_v23 = vrot.slane %v421_v17, 4 }
 0x138   :  { %v453_v24 = vadd.f32 %v452_v62, %v451_v10  ;;  %v458_v25 = vrot.slane %v457_v18, 2  ;;  %v463_v26 = vadd.f32 %v462_v19, %v424_v8  ;;  %v468_v37 = vrot.slane %v425_v27, 4 }
 0x139   :  { %v430_v28 = vrot.slane %v429_v21, 1  ;;  %v435_v29 = vadd.f32 %v434_v22, %v433_v14  ;;  %v440_v13 = vrot.slane %v439_v3, 2  ;;  %v445_v30 = vadd.f32 %v444_v23, %v421_v17 }
 0x13a   :  { %v454_v31 = vrot.slane %v453_v24, 1  ;;  %v459_v32 = vadd.f32 %v458_v25, %v457_v18  ;;  %v464_v33 = vrot.slane %v463_v26, 2  ;;  %v469_v45 = vadd.f32 %v468_v37, %v425_v27 }
 0x13b   :  { %v431_v34 = vadd.f32 %v430_v28, %v429_v21  ;;  %v436_v35 = vrot.slane %v435_v29, 1  ;;  %v441_v36 = vadd.f32 %v440_v13, %v439_v3  ;;  %v446_v39 = vrot.slane %v445_v30, 2 }
 0x13c   :  { %v455_v40 = vadd.f32 %v454_v31, %v453_v24  ;;  %v460_v41 = vrot.slane %v459_v32, 1  ;;  %v465_v42 = vadd.f32 %v464_v33, %v463_v26  ;;  %v470_v57 = vrot.slane %v469_v45, 2 }
 0x13d   :  { %v437_v43 = vadd.f32 %v436_v35, %v435_v29  ;;  %v442_v44 = vrot.slane %v441_v36, 1  ;;  %v486_v46 = vmul.f32 %v891_v38, %v431_v34  ;;  %v447_v49 = vadd.f32 %v446_v39, %v445_v30 }
 0x13e   :  { %v461_v50 = vadd.f32 %v460_v41, %v459_v32  ;;  %v466_v54 = vrot.slane %v465_v42, 1  ;;  %v490_v55 = vmul.f32 %v480_v53, %v455_v40  ;;  %v471_v63 = vadd.f32 %v470_v57, %v469_v45 }
 0x13f   :  { %v443_v56 = vadd.f32 %v442_v44, %v441_v36  ;;  %v487_v47 = vmul.f32 %v891_v38, %v437_v43  ;;  %v448_v59 = vrot.slane %v447_v49, 1  ;;  %v481_v0 = vrot.slane %v891_v38, 3 }
 0x140   :  { %v491_v60 = vmul.f32 %v480_v53, %v461_v50  ;;  %v467_v48 = vadd.f32 %v466_v54, %v465_v42  ;;  %v472_v5 = vrot.slane %v471_v63, 1 }
 0x141   :  { %v502_v51 = vcombine.low %v486_v46, %v487_v47  ;;  %v449_v1 = vadd.f32 %v448_v59, %v447_v49  ;;  %v488_v2 = vmul.f32 %v479_v58, %v443_v56 }
 0x142   :  { %v504_v4 = vcombine.low %v490_v55, %v491_v60  ;;  %v473_v7 = vadd.f32 %v472_v5, %v471_v63  ;;  %v492_v52 = vmul.f32 %v481_v0, %v467_v48 }
 0x143   :  { %v489_v6 = vmul.f32 %v479_v58, %v449_v1 }
 0x144   :  { %v493_v9 = vmul.f32 %v481_v0, %v473_v7  ;;  %v511_v61 = vrot.slane %v504_v4, 6 }
 0x145   :  { %v503_v8 = vcombine.low %v488_v2, %v489_v6 }
 0x146   :  { %v505_v10 = vcombine.low %v492_v52, %v493_v9 }
 0x147   :  { %v506_v53 = vrot.slane %v503_v8, 7 }
 0x148   :  { %v516_v15 = vrot.slane %v505_v10, 5 }
 0x149   :  { %v508_v11 = vsel %vm507_vm0, %v506_v53, %v502_v51 }
 0x14a   :  { %v510_v12 = vsel %vm509_vm1, %v506_v53, %v508_v11 }
 0x14b   :  { %v513_v14 = vsel %vm512_vm2, %v511_v61, %v510_v12 }
 0x14c   :  { %v515_v38 = vsel %vm514_vm3, %v511_v61, %v513_v14 }
 0x14d   :  { %v518_v58 = vsel %vm517_vm4, %v516_v15, %v515_v38 }
 0x14e   :  { %v520_v16 = vsel %vm519_vm5, %v516_v15, %v518_v58 }
 0x14f   :  { %522 = vst [vmem:[#allocation3] sm:$0xff] %v520_v16 }
 0x150   :  { %689 = shalt.err (!%p686_p4)
}
 0x151   :  { %s690_s13 = scalar_lea.hbm %s930_s4, 128 }
 0x152   :  { %p691_p5 = scmp.ne.s32.totalorder %s930_s4, %s690_s13  ;;  %p694_p6 = scmp.lt.u32.totalorder %s690_s13, %s930_s4 }
 0x154   :  { %p696_p7 = pnand %p694_p6, %p691_p5 }
 0x156   :  { %699 = shalt.err (!%p696_p7)
}
 0x157   :  { %532 = dma.vmem_to_hbm [thread:$0]  %s530_s1, 128, %s930_s4, [#allocation4]  }
 0x158   :  { %700 = dma.done.wait [#allocation4], 128  }
 0x159   :  { %701 = vsyncadd [#allocation4], 4294967168 }
 0x15a   :  { %536 = vsyncpa [#allocation4], 1 }

</bundles_post_ra>
